<compile_context>
chip_gen: v7x
topology: tpu7x:2x2x1
jax: 0.10.0
libtpu: 0.0.40
codegen_flags: <defaults>
</compile_context>

<pallas_src>
import functools

import jax
import jax.numpy as jnp
from jax import lax
from jax.experimental import pallas as pl
from jax.experimental.pallas import tpu as pltpu


def _round_up(a, m):
    return ((a + m - 1) // m) * m


def _build_terms(inp_dim, ignore_pos, expand_theta):
    """Static (x_column, weight_row, transform) mapping for the fused input build."""
    terms = []
    if ignore_pos:
        for k in range(inp_dim - 3):
            terms.append((3 + k, k, None))                 # features only
    elif expand_theta:
        nf = inp_dim - 3
        terms.append((0, 0, None))                         # pos x
        terms.append((1, 1, None))                         # pos y
        for f in range(nf):
            terms.append((3 + f, 2 + f, None))             # features
        terms.append((2, 2 + nf, "cos"))                   # cos(theta)
        terms.append((2, 3 + nf, "sin"))                   # sin(theta)
    else:
        for k in range(inp_dim):
            terms.append((k, k, None))                     # full x
    return tuple(terms)


# ------------------------------------------------------------------ kernel --
def _embedder_kernel(x_ref, w_ref, b_ref, g_ref, beta_ref, o_ref, *,
                     terms, pack, inp_dim, emb_dim, layer_norm, eps):
    # x_ref: [tile_p, pack*inp_dim]   (pack original rows folded into lanes)
    # w_ref: [in_features, emb_dim],  b/g/beta: [1, emb_dim]
    # o_ref: [tile_p, pack*emb_dim]   (lane-dense output slab)
    x = x_ref[...].astype(jnp.float32)
    w = w_ref[...].astype(jnp.float32)
    tile_p = x.shape[0]

    # Hoisted broadcasts -- reused across all packed sub-rows.
    b_full = jnp.broadcast_to(b_ref[...].astype(jnp.float32), (tile_p, emb_dim))
    if layer_norm:
        g = g_ref[...].astype(jnp.float32)
        beta = beta_ref[...].astype(jnp.float32)

    ys = []
    for p in range(pack):
        base = p * inp_dim
        acc = b_full
        # Unrolled VPU FMA over the (tiny) reduction dim -- no MXU.
        for (col, row, fn) in terms:
            xc = x[:, base + col:base + col + 1]           # [tile_p, 1]
            if fn == "cos":
                xc = jnp.cos(xc)
            elif fn == "sin":
                xc = jnp.sin(xc)
            acc = acc + xc * w[row:row + 1, :]
        y = jnp.maximum(acc, 0.0)                          # ReLU
        if layer_norm:
            mean = jnp.mean(y, axis=-1, keepdims=True)
            var = jnp.mean((y - mean) * (y - mean), axis=-1, keepdims=True)
            y = (y - mean) * lax.rsqrt(var + eps)
            y = y * g + beta
        ys.append(y)

    out = ys[0] if pack == 1 else jnp.concatenate(ys, axis=-1)
    o_ref[...] = out.astype(o_ref.dtype)                   # single lane-dense store


# ----------------------------------------------------------- pallas wrapper --
def _embed_pallas(x_flat, w, b, gamma, beta, *, terms, inp_dim, layer_norm,
                  eps=1e-5, max_tile_rows=1024):
    n = x_flat.shape[0]
    in_features, emb_dim = w.shape

    # Lane-packing factor: fold `pack` consecutive rows into one 128-lane row.
    if emb_dim < 128 and 128 % emb_dim == 0:
        pack = 128 // emb_dim
    else:
        pack = 1

    rows = -(-n // pack)                                   # packed rows (ceil)
    tile_p = min(max_tile_rows, _round_up(rows, 8))        # sublane-aligned tile
    n_tiles = -(-rows // tile_p)
    rows_pad = n_tiles * tile_p
    n_pad = rows_pad * pack

    if n_pad != n:
        # Padded rows produce well-defined values (eps keeps LN finite) and are
        # sliced off below.
        x_flat = jnp.pad(x_flat, ((0, n_pad - n), (0, 0)))
    x_packed = x_flat.reshape(rows_pad, pack * inp_dim)    # free (row-major) reshape

    kernel = functools.partial(
        _embedder_kernel, terms=terms, pack=pack, inp_dim=inp_dim,
        emb_dim=emb_dim, layer_norm=layer_norm, eps=eps)

    out_packed = pl.pallas_call(
        kernel,
        out_shape=jax.ShapeDtypeStruct((rows_pad, pack * emb_dim), jnp.float32),
        grid=(n_tiles,),
        in_specs=[
            pl.BlockSpec((tile_p, pack * inp_dim), lambda i: (i, 0)),
            pl.BlockSpec((in_features, emb_dim), lambda i: (0, 0)),   # resident
            pl.BlockSpec((1, emb_dim), lambda i: (0, 0)),
            pl.BlockSpec((1, emb_dim), lambda i: (0, 0)),
            pl.BlockSpec((1, emb_dim), lambda i: (0, 0)),
        ],
        out_specs=pl.BlockSpec((tile_p, pack * emb_dim), lambda i: (i, 0)),
        compiler_params=pltpu.CompilerParams(
            dimension_semantics=("parallel",)),
    )(x_packed, w, b, gamma, beta)

    out = out_packed.reshape(n_pad, emb_dim)               # free reshape back
    return out[:n] if n_pad != n else out


def _embedder_forward(x, w, b, gamma, beta, *, terms, inp_dim, emb_dim, layer_norm):
    lead = x.shape[:-1]
    flat = x.reshape(-1, inp_dim).astype(jnp.float32)
    out = _embed_pallas(flat, w, b, gamma, beta, terms=terms, inp_dim=inp_dim,
                        layer_norm=layer_norm)
    return out.reshape(*lead, emb_dim)


# -------------------------------------------------------------- module glue --
class EmbedderPallas:
    def __init__(self, inp_dim, emb_dim, ignore_pos=True, expand_theta=False,
                 layer_norm=False, key=None):
        self.ignore_pos = ignore_pos
        if self.ignore_pos:
            assert not expand_theta
            self.inp_dim = inp_dim - 3
        else:
            self.inp_dim = inp_dim
        self.raw_inp_dim = inp_dim
        self.emb_dim = emb_dim
        self.expand_theta = expand_theta
        self.layer_norm = layer_norm

        in_features = self.inp_dim + 1 if self.expand_theta else self.inp_dim
        self.in_features = in_features
        self._terms = _build_terms(inp_dim, ignore_pos, expand_theta)
        assert len(self._terms) == in_features

        # Deterministic parameter init (mimic nn.Linear uniform(-1/sqrt(in), 1/sqrt(in))).
        key = jax.random.PRNGKey(42) if key is None else key
        kw, kb = jax.random.split(key)
        bound = 1.0 / float(in_features) ** 0.5
        # PyTorch stores weight as (emb_dim, in_features); kernel consumes W^T.
        w_t = jax.random.uniform(kw, (in_features, emb_dim), jnp.float32, -bound, bound)
        bb = jax.random.uniform(kb, (1, emb_dim), jnp.float32, -bound, bound)
        gamma = jnp.ones((1, emb_dim), jnp.float32)
        beta = jnp.zeros((1, emb_dim), jnp.float32)
        self.params = dict(w=w_t, b=bb, gamma=gamma, beta=beta)

        # jit the whole forward so pad/reshape/slice fuse with the pallas_call
        # (no extra standalone HBM passes for the ignore_pos slice etc.).
        self._fwd = jax.jit(functools.partial(
            _embedder_forward, terms=self._terms, inp_dim=inp_dim,
            emb_dim=emb_dim, layer_norm=layer_norm))

    def __call__(self, x):
        p = self.params
        return self._fwd(x, p["w"], p["b"], p["gamma"], p["beta"])


# ---------------------------------------------------------------- reference --
def _ref_forward(mod: EmbedderPallas, x):
    pos = x[..., :2]
    theta = x[..., 2:3]
    features = x[..., 3:]
    if mod.ignore_pos:
        inp = features
    elif mod.expand_theta:
        inp = jnp.concatenate([pos, features, jnp.cos(theta), jnp.sin(theta)], axis=-1)
    else:
        inp = x
    y = jnp.maximum(inp.astype(jnp.float32) @ mod.params["w"] + mod.params["b"][0], 0.0)
    if mod.layer_norm:
        mean = jnp.mean(y, axis=-1, keepdims=True)
        var = jnp.mean((y - mean) ** 2, axis=-1, keepdims=True)
        y = (y - mean) / jnp.sqrt(var + 1e-5)
        y = y * mod.params["gamma"][0] + mod.params["beta"][0]
    return y


if __name__ == "__main__":
    key = jax.random.PRNGKey(0)
    batch, seq, inp_dim, emb_dim = 2, 8, 7, 32
    x = jax.random.normal(key, (batch, seq, inp_dim), jnp.float32)

    # Default config: ignore_pos=True, expand_theta=False, layer_norm=False.
    mod = EmbedderPallas(inp_dim, emb_dim, ignore_pos=True, layer_norm=False,
                         key=jax.random.PRNGKey(1))
    y = mod(x)
    jax.block_until_ready(y)
    assert y.shape == (batch, seq, emb_dim)
    assert jnp.allclose(y, _ref_forward(mod, x), atol=1e-5, rtol=1e-5)

    # expand_theta + layer_norm path (cos/sin + LN fused in-kernel).
    mod_ln = EmbedderPallas(inp_dim, emb_dim, ignore_pos=False, expand_theta=True,
                            layer_norm=True, key=jax.random.PRNGKey(2))
    y_ln = mod_ln(x)
    jax.block_until_ready(y_ln)
    assert jnp.allclose(y_ln, _ref_forward(mod_ln, x), atol=1e-5, rtol=1e-5)

    # Plain path (full x as input).
    mod_plain = EmbedderPallas(inp_dim, emb_dim, ignore_pos=False, expand_theta=False,
                               layer_norm=False, key=jax.random.PRNGKey(3))
    y_pl = mod_plain(x)
    jax.block_until_ready(y_pl)
    assert jnp.allclose(y_pl, _ref_forward(mod_plain, x), atol=1e-5, rtol=1e-5)

    print("KERNEL_OK")
</pallas_src>

<mosaic_0001>
module attributes {stable_mosaic.version = 11 : i64} {
  func.func @_embedder_kernel(%arg0: i32, %arg1: memref<8x28xf32, #tpu.memory_space<vmem>>, %arg2: memref<4x32xf32, #tpu.memory_space<vmem>>, %arg3: memref<1x32xf32, #tpu.memory_space<vmem>>, %arg4: memref<1x32xf32, #tpu.memory_space<vmem>>, %arg5: memref<1x32xf32, #tpu.memory_space<vmem>>, %arg6: memref<8x128xf32, #tpu.memory_space<vmem>>) attributes {dimension_semantics = [#tpu.dimension_semantics<parallel>], iteration_bounds = array<i64: 1>, scalar_prefetch = 0 : i64, scratch_operands = 0 : i64, tpu.core_type = #tpu.core_type<tc>, window_params = [{transform_indices = @transform_0, window_bounds = array<i64: 8, 28>}, {pipeline_mode = #tpu.pipeline_mode<synchronous>, transform_indices = @transform_1, window_bounds = array<i64: 4, 32>}, {pipeline_mode = #tpu.pipeline_mode<synchronous>, transform_indices = @transform_2, window_bounds = array<i64: 1, 32>}, {pipeline_mode = #tpu.pipeline_mode<synchronous>, transform_indices = @transform_3, window_bounds = array<i64: 1, 32>}, {pipeline_mode = #tpu.pipeline_mode<synchronous>, transform_indices = @transform_4, window_bounds = array<i64: 1, 32>}, {transform_indices = @transform_5, window_bounds = array<i64: 8, 128>}]} {
    %c0 = arith.constant 0 : index
    %c0_0 = arith.constant 0 : index
    %0 = vector.load %arg1[%c0, %c0_0] : memref<8x28xf32, #tpu.memory_space<vmem>>, vector<8x28xf32>
    %c0_1 = arith.constant 0 : index
    %c0_2 = arith.constant 0 : index
    %1 = vector.load %arg2[%c0_1, %c0_2] : memref<4x32xf32, #tpu.memory_space<vmem>>, vector<4x32xf32>
    %c0_3 = arith.constant 0 : index
    %c0_4 = arith.constant 0 : index
    %2 = vector.load %arg3[%c0_3, %c0_4] : memref<1x32xf32, #tpu.memory_space<vmem>>, vector<1x32xf32>
    %3 = vector.shape_cast %2 : vector<1x32xf32> to vector<1x32xf32>
    %4 = vector.broadcast %3 : vector<1x32xf32> to vector<8x32xf32>
    %5 = vector.extract_strided_slice %0 {offsets = [0, 3], sizes = [8, 1], strides = [1, 1]} : vector<8x28xf32> to vector<8x1xf32>
    %6 = vector.extract_strided_slice %1 {offsets = [0, 0], sizes = [1, 32], strides = [1, 1]} : vector<4x32xf32> to vector<1x32xf32>
    %7 = vector.broadcast %5 : vector<8x1xf32> to vector<8x32xf32>
    %8 = vector.broadcast %6 : vector<1x32xf32> to vector<8x32xf32>
    %9 = arith.mulf %7, %8 : vector<8x32xf32>
    %10 = arith.addf %4, %9 : vector<8x32xf32>
    %11 = vector.extract_strided_slice %0 {offsets = [0, 4], sizes = [8, 1], strides = [1, 1]} : vector<8x28xf32> to vector<8x1xf32>
    %12 = vector.extract_strided_slice %1 {offsets = [1, 0], sizes = [1, 32], strides = [1, 1]} : vector<4x32xf32> to vector<1x32xf32>
    %13 = vector.broadcast %11 : vector<8x1xf32> to vector<8x32xf32>
    %14 = vector.broadcast %12 : vector<1x32xf32> to vector<8x32xf32>
    %15 = arith.mulf %13, %14 : vector<8x32xf32>
    %16 = arith.addf %10, %15 : vector<8x32xf32>
    %17 = vector.extract_strided_slice %0 {offsets = [0, 5], sizes = [8, 1], strides = [1, 1]} : vector<8x28xf32> to vector<8x1xf32>
    %18 = vector.extract_strided_slice %1 {offsets = [2, 0], sizes = [1, 32], strides = [1, 1]} : vector<4x32xf32> to vector<1x32xf32>
    %19 = vector.broadcast %17 : vector<8x1xf32> to vector<8x32xf32>
    %20 = vector.broadcast %18 : vector<1x32xf32> to vector<8x32xf32>
    %21 = arith.mulf %19, %20 : vector<8x32xf32>
    %22 = arith.addf %16, %21 : vector<8x32xf32>
    %23 = vector.extract_strided_slice %0 {offsets = [0, 6], sizes = [8, 1], strides = [1, 1]} : vector<8x28xf32> to vector<8x1xf32>
    %24 = vector.extract_strided_slice %1 {offsets = [3, 0], sizes = [1, 32], strides = [1, 1]} : vector<4x32xf32> to vector<1x32xf32>
    %25 = vector.broadcast %23 : vector<8x1xf32> to vector<8x32xf32>
    %26 = vector.broadcast %24 : vector<1x32xf32> to vector<8x32xf32>
    %27 = arith.mulf %25, %26 : vector<8x32xf32>
    %28 = arith.addf %22, %27 : vector<8x32xf32>
    %cst = arith.constant 0.000000e+00 : f32
    %29 = vector.broadcast %cst : f32 to vector<8x32xf32>
    %30 = arith.maximumf %28, %29 : vector<8x32xf32>
    %31 = vector.extract_strided_slice %0 {offsets = [0, 10], sizes = [8, 1], strides = [1, 1]} : vector<8x28xf32> to vector<8x1xf32>
    %32 = vector.extract_strided_slice %1 {offsets = [0, 0], sizes = [1, 32], strides = [1, 1]} : vector<4x32xf32> to vector<1x32xf32>
    %33 = vector.broadcast %31 : vector<8x1xf32> to vector<8x32xf32>
    %34 = vector.broadcast %32 : vector<1x32xf32> to vector<8x32xf32>
    %35 = arith.mulf %33, %34 : vector<8x32xf32>
    %36 = arith.addf %4, %35 : vector<8x32xf32>
    %37 = vector.extract_strided_slice %0 {offsets = [0, 11], sizes = [8, 1], strides = [1, 1]} : vector<8x28xf32> to vector<8x1xf32>
    %38 = vector.extract_strided_slice %1 {offsets = [1, 0], sizes = [1, 32], strides = [1, 1]} : vector<4x32xf32> to vector<1x32xf32>
    %39 = vector.broadcast %37 : vector<8x1xf32> to vector<8x32xf32>
    %40 = vector.broadcast %38 : vector<1x32xf32> to vector<8x32xf32>
    %41 = arith.mulf %39, %40 : vector<8x32xf32>
    %42 = arith.addf %36, %41 : vector<8x32xf32>
    %43 = vector.extract_strided_slice %0 {offsets = [0, 12], sizes = [8, 1], strides = [1, 1]} : vector<8x28xf32> to vector<8x1xf32>
    %44 = vector.extract_strided_slice %1 {offsets = [2, 0], sizes = [1, 32], strides = [1, 1]} : vector<4x32xf32> to vector<1x32xf32>
    %45 = vector.broadcast %43 : vector<8x1xf32> to vector<8x32xf32>
    %46 = vector.broadcast %44 : vector<1x32xf32> to vector<8x32xf32>
    %47 = arith.mulf %45, %46 : vector<8x32xf32>
    %48 = arith.addf %42, %47 : vector<8x32xf32>
    %49 = vector.extract_strided_slice %0 {offsets = [0, 13], sizes = [8, 1], strides = [1, 1]} : vector<8x28xf32> to vector<8x1xf32>
    %50 = vector.extract_strided_slice %1 {offsets = [3, 0], sizes = [1, 32], strides = [1, 1]} : vector<4x32xf32> to vector<1x32xf32>
    %51 = vector.broadcast %49 : vector<8x1xf32> to vector<8x32xf32>
    %52 = vector.broadcast %50 : vector<1x32xf32> to vector<8x32xf32>
    %53 = arith.mulf %51, %52 : vector<8x32xf32>
    %54 = arith.addf %48, %53 : vector<8x32xf32>
    %cst_5 = arith.constant 0.000000e+00 : f32
    %55 = vector.broadcast %cst_5 : f32 to vector<8x32xf32>
    %56 = arith.maximumf %54, %55 : vector<8x32xf32>
    %57 = vector.extract_strided_slice %0 {offsets = [0, 17], sizes = [8, 1], strides = [1, 1]} : vector<8x28xf32> to vector<8x1xf32>
    %58 = vector.extract_strided_slice %1 {offsets = [0, 0], sizes = [1, 32], strides = [1, 1]} : vector<4x32xf32> to vector<1x32xf32>
    %59 = vector.broadcast %57 : vector<8x1xf32> to vector<8x32xf32>
    %60 = vector.broadcast %58 : vector<1x32xf32> to vector<8x32xf32>
    %61 = arith.mulf %59, %60 : vector<8x32xf32>
    %62 = arith.addf %4, %61 : vector<8x32xf32>
    %63 = vector.extract_strided_slice %0 {offsets = [0, 18], sizes = [8, 1], strides = [1, 1]} : vector<8x28xf32> to vector<8x1xf32>
    %64 = vector.extract_strided_slice %1 {offsets = [1, 0], sizes = [1, 32], strides = [1, 1]} : vector<4x32xf32> to vector<1x32xf32>
    %65 = vector.broadcast %63 : vector<8x1xf32> to vector<8x32xf32>
    %66 = vector.broadcast %64 : vector<1x32xf32> to vector<8x32xf32>
    %67 = arith.mulf %65, %66 : vector<8x32xf32>
    %68 = arith.addf %62, %67 : vector<8x32xf32>
    %69 = vector.extract_strided_slice %0 {offsets = [0, 19], sizes = [8, 1], strides = [1, 1]} : vector<8x28xf32> to vector<8x1xf32>
    %70 = vector.extract_strided_slice %1 {offsets = [2, 0], sizes = [1, 32], strides = [1, 1]} : vector<4x32xf32> to vector<1x32xf32>
    %71 = vector.broadcast %69 : vector<8x1xf32> to vector<8x32xf32>
    %72 = vector.broadcast %70 : vector<1x32xf32> to vector<8x32xf32>
    %73 = arith.mulf %71, %72 : vector<8x32xf32>
    %74 = arith.addf %68, %73 : vector<8x32xf32>
    %75 = vector.extract_strided_slice %0 {offsets = [0, 20], sizes = [8, 1], strides = [1, 1]} : vector<8x28xf32> to vector<8x1xf32>
    %76 = vector.extract_strided_slice %1 {offsets = [3, 0], sizes = [1, 32], strides = [1, 1]} : vector<4x32xf32> to vector<1x32xf32>
    %77 = vector.broadcast %75 : vector<8x1xf32> to vector<8x32xf32>
    %78 = vector.broadcast %76 : vector<1x32xf32> to vector<8x32xf32>
    %79 = arith.mulf %77, %78 : vector<8x32xf32>
    %80 = arith.addf %74, %79 : vector<8x32xf32>
    %cst_6 = arith.constant 0.000000e+00 : f32
    %81 = vector.broadcast %cst_6 : f32 to vector<8x32xf32>
    %82 = arith.maximumf %80, %81 : vector<8x32xf32>
    %83 = vector.extract_strided_slice %0 {offsets = [0, 24], sizes = [8, 1], strides = [1, 1]} : vector<8x28xf32> to vector<8x1xf32>
    %84 = vector.extract_strided_slice %1 {offsets = [0, 0], sizes = [1, 32], strides = [1, 1]} : vector<4x32xf32> to vector<1x32xf32>
    %85 = vector.broadcast %83 : vector<8x1xf32> to vector<8x32xf32>
    %86 = vector.broadcast %84 : vector<1x32xf32> to vector<8x32xf32>
    %87 = arith.mulf %85, %86 : vector<8x32xf32>
    %88 = arith.addf %4, %87 : vector<8x32xf32>
    %89 = vector.extract_strided_slice %0 {offsets = [0, 25], sizes = [8, 1], strides = [1, 1]} : vector<8x28xf32> to vector<8x1xf32>
    %90 = vector.extract_strided_slice %1 {offsets = [1, 0], sizes = [1, 32], strides = [1, 1]} : vector<4x32xf32> to vector<1x32xf32>
    %91 = vector.broadcast %89 : vector<8x1xf32> to vector<8x32xf32>
    %92 = vector.broadcast %90 : vector<1x32xf32> to vector<8x32xf32>
    %93 = arith.mulf %91, %92 : vector<8x32xf32>
    %94 = arith.addf %88, %93 : vector<8x32xf32>
    %95 = vector.extract_strided_slice %0 {offsets = [0, 26], sizes = [8, 1], strides = [1, 1]} : vector<8x28xf32> to vector<8x1xf32>
    %96 = vector.extract_strided_slice %1 {offsets = [2, 0], sizes = [1, 32], strides = [1, 1]} : vector<4x32xf32> to vector<1x32xf32>
    %97 = vector.broadcast %95 : vector<8x1xf32> to vector<8x32xf32>
    %98 = vector.broadcast %96 : vector<1x32xf32> to vector<8x32xf32>
    %99 = arith.mulf %97, %98 : vector<8x32xf32>
    %100 = arith.addf %94, %99 : vector<8x32xf32>
    %101 = vector.extract_strided_slice %0 {offsets = [0, 27], sizes = [8, 1], strides = [1, 1]} : vector<8x28xf32> to vector<8x1xf32>
    %102 = vector.extract_strided_slice %1 {offsets = [3, 0], sizes = [1, 32], strides = [1, 1]} : vector<4x32xf32> to vector<1x32xf32>
    %103 = vector.broadcast %101 : vector<8x1xf32> to vector<8x32xf32>
    %104 = vector.broadcast %102 : vector<1x32xf32> to vector<8x32xf32>
    %105 = arith.mulf %103, %104 : vector<8x32xf32>
    %106 = arith.addf %100, %105 : vector<8x32xf32>
    %cst_7 = arith.constant 0.000000e+00 : f32
    %107 = vector.broadcast %cst_7 : f32 to vector<8x32xf32>
    %108 = arith.maximumf %106, %107 : vector<8x32xf32>
    %109 = tpu.concatenate %30, %56, %82, %108 in 1 : vector<8x32xf32>, vector<8x32xf32>, vector<8x32xf32>, vector<8x32xf32> -> vector<8x128xf32>
    %c0_8 = arith.constant 0 : index
    %c0_9 = arith.constant 0 : index
    %110 = vector.load %arg6[%c0_8, %c0_9] : memref<8x128xf32, #tpu.memory_space<vmem>>, vector<8x128xf32>
    tpu.vector_store %arg6[%c0_8, %c0_9], %109 {strides = array<i32>} : memref<8x128xf32, #tpu.memory_space<vmem>>, vector<8x128xf32>,
    return
  }
  func.func @transform_0(%arg0: i32) -> (i32, i32) {
    %c0_i32 = arith.constant 0 : i32
    %c0_i32_0 = arith.constant 0 : i32
    return %arg0, %c0_i32 : i32, i32
  }
  func.func @transform_1(%arg0: i32) -> (i32, i32) {
    %c0_i32 = arith.constant 0 : i32
    %c0_i32_0 = arith.constant 0 : i32
    %c0_i32_1 = arith.constant 0 : i32
    return %c0_i32, %c0_i32_0 : i32, i32
  }
  func.func @transform_2(%arg0: i32) -> (i32, i32) {
    %c0_i32 = arith.constant 0 : i32
    %c0_i32_0 = arith.constant 0 : i32
    %c0_i32_1 = arith.constant 0 : i32
    return %c0_i32, %c0_i32_0 : i32, i32
  }
  func.func @transform_3(%arg0: i32) -> (i32, i32) {
    %c0_i32 = arith.constant 0 : i32
    %c0_i32_0 = arith.constant 0 : i32
    %c0_i32_1 = arith.constant 0 : i32
    return %c0_i32, %c0_i32_0 : i32, i32
  }
  func.func @transform_4(%arg0: i32) -> (i32, i32) {
    %c0_i32 = arith.constant 0 : i32
    %c0_i32_0 = arith.constant 0 : i32
    %c0_i32_1 = arith.constant 0 : i32
    return %c0_i32, %c0_i32_0 : i32, i32
  }
  func.func @transform_5(%arg0: i32) -> (i32, i32) {
    %c0_i32 = arith.constant 0 : i32
    %c0_i32_0 = arith.constant 0 : i32
    return %arg0, %c0_i32 : i32, i32
  }
}

</mosaic_0001>

<bundles_post_ra>
// kernel: _embedder_forward.1
= control target key start
LH: loop header
LB: loop body
LE: loop exit
PB: predicated region body
PF: predicated region fallthrough
CT: control target
= control target key end

     0   :  { %v206_v0 = vmov 11   ;;  %v207_v1 = vmov 10   ;;  %v208_v3 = vmov 24   ;;  %v209_v4 = vmov 17   ;;  %s224_s21 = smov 64   ;;  %s267_s0 = inlined_call_operand.vmem [shape: f32[8,28], index: 0, kind: input, shape index: {}]   ;;  %s268_s3 = inlined_call_operand.vmem [shape: f32[1,32], index: 3, kind: input, shape index: {}]   ;;  %s269_s4 = inlined_call_operand.vmem [shape: f32[1,32], index: 4, kind: input, shape index: {}]   ;;  %s270_s1 = inlined_call_operand.vmem [shape: f32[4,32], index: 1, kind: input, shape index: {}]   ;;  %s271_s2 = inlined_call_operand.vmem [shape: f32[1,32], index: 2, kind: input, shape index: {}]   ;;  %s272_s5 = inlined_call_operand.vmem [shape: f32[8,128], index: 5, kind: output, shape index: {}]  }
   0x1   :  { %191 = vset.pattern.permute.xlu1 %v206_v0  ;;  %189 = vset.pattern.permute.xlu0 %v207_v1  ;;  %v20_v2 = vld [vmem:[%s267_s0] sm:$0xff]  ;;  %v210_v5 = vmov 18   ;;  %v211_v6 = vmov 12   ;;  %v212_v7 = vmov 25   ;;  %v213_v8 = vmov 13  }
   0x2   :  { %78 = vperm.xlu1 %191, %v20_v2   ;;  %72 = vperm.xlu0 %189, %v20_v2   ;;  %v214_v9 = vmov 19   ;;  %v215_v10 = vmov 27   ;;  %v216_v11 = vmov 26   ;;  %v217_v12 = vmov 5   ;;  %v21_v20 = vld [vmem:[%s270_s1] sm:$0xf] }
   0x3   :  { %v218_v13 = vmov 20   ;;  %v219_v14 = vmov 3   ;;  %v220_v15 = vmov 4   ;;  %v221_v16 = vmov 6   ;;  %v169_v29 = vld [vmem:[%s271_s2] ss:$0 sm:$0xff] }
   0x4   :  { %v34_v17 = vlaneseq  ;;  %s222_s1 = smov 32   ;;  %s223_s2 = smov 96   ;;  %vm158_vm0 = vcmask 261120   ;;  %vm160_vm1 = vcmask 523264   ;;  %vm162_vm2 = vcmask 785408  }
   0x6   :  { %192 = vset.pattern.permute.xlu1 %v208_v3  ;;  %190 = vset.pattern.permute.xlu0 %v209_v4  ;;  %v35_v18 = vshrl.u32 %v34_v17, 7 }
   0x7   :  { %122 = vperm.xlu1 %192, %v20_v2   ;;  %97 = vperm.xlu0 %190, %v20_v2  }
   0x8   :  { %v36_v19 = vsub.s32 0, %v35_v18  ;;  %v46_v24 = vsub.s32 1, %v35_v18  ;;  %v56_v25 = vsub.s32 2, %v35_v18  ;;  %v66_v32 = vsub.s32 3, %v35_v18 }
   0xa   :  { %v37_v23 = vrot.slane %v21_v20, %v36_v19  ;;  %v47_v30 = vrot.slane %v21_v20, %v46_v24  ;;  %v57_v31 = vrot.slane %v21_v20, %v56_v25  ;;  %v67_v38 = vrot.slane %v21_v20, %v66_v32 }
   0xb   :  { %193 = vset.pattern.permute.xlu1 %v210_v5  ;;  %194 = vset.pattern.permute.xlu0 %v211_v6 }
   0xc   :  { %103 = vperm.xlu1 %193, %v20_v2   ;;  %84 = vperm.xlu0 %194, %v20_v2  }
  0x10   :  { %195 = vset.pattern.permute.xlu1 %v212_v7  ;;  %197 = vset.pattern.permute.xlu0 %v213_v8 }
  0x11   :  { %128 = vperm.xlu1 %195, %v20_v2   ;;  %90 = vperm.xlu0 %197, %v20_v2  }
  0x15   :  { %196 = vset.pattern.permute.xlu1 %v214_v9  ;;  %200 = vset.pattern.permute.xlu0 %v215_v10 }
  0x16   :  { %109 = vperm.xlu1 %196, %v20_v2   ;;  %140 = vperm.xlu0 %200, %v20_v2  }
  0x1a   :  { %198 = vset.pattern.permute.xlu1 %v216_v11  ;;  %203 = vset.pattern.permute.xlu0 %v217_v12 }
  0x1b   :  { %134 = vperm.xlu1 %198, %v20_v2   ;;  %51 = vperm.xlu0 %203, %v20_v2  }
  0x1f   :  { %199 = vset.pattern.permute.xlu1 %v218_v13  ;;  %205 = vset.pattern.permute.xlu0 %v215_v10 }
  0x20   :  { %115 = vperm.xlu1 %199, %v20_v2  }
  0x24   :  { %201 = vset.pattern.permute.xlu1 %v219_v14 }
  0x25   :  { %31 = vperm.xlu1 %201, %v20_v2  }
  0x29   :  { %202 = vset.pattern.permute.xlu1 %v220_v15 }
  0x2a   :  { %41 = vperm.xlu1 %202, %v20_v2  }
  0x2e   :  { %204 = vset.pattern.permute.xlu1 %v221_v16 }
  0x2f   :  { %61 = vperm.xlu1 %204, %v20_v2  }
  0x81   :  { %v79_v21 = vpop.permute.xlu1 %78  ;;  %v73_v22 = vpop.permute.xlu0 %72 }
  0x82   :  { %v75_v28 = vmul.f32 %v73_v22, %v37_v23  ;;  %v81_v36 = vmul.f32 %v79_v21, %v47_v30 }
  0x84   :  { %v76_v33 = vadd.f32 %v169_v29, %v75_v28 }
  0x86   :  { %v123_v26 = vpop.permute.xlu1 %122  ;;  %v98_v27 = vpop.permute.xlu0 %97  ;;  %v82_v39 = vadd.f32 %v81_v36, %v76_v33 }
  0x87   :  { %v125_v45 = vmul.f32 %v123_v26, %v37_v23  ;;  %v100_v48 = vmul.f32 %v98_v27, %v37_v23 }
  0x89   :  { %v126_v51 = vadd.f32 %v169_v29, %v125_v45  ;;  %v101_v52 = vadd.f32 %v169_v29, %v100_v48 }
  0x8b   :  { %v104_v34 = vpop.permute.xlu1 %103  ;;  %v85_v35 = vpop.permute.xlu0 %84 }
  0x8c   :  { %v87_v37 = vmul.f32 %v85_v35, %v57_v31  ;;  %v106_v53 = vmul.f32 %v104_v34, %v47_v30 }
  0x8e   :  { %v88_v42 = vadd.f32 %v87_v37, %v82_v39  ;;  %v107_v60 = vadd.f32 %v106_v53, %v101_v52 }
  0x90   :  { %v129_v40 = vpop.permute.xlu1 %128  ;;  %v91_v41 = vpop.permute.xlu0 %90 }
  0x91   :  { %v93_v43 = vmul.f32 %v91_v41, %v67_v38  ;;  %v131_v49 = vmul.f32 %v129_v40, %v47_v30 }
  0x93   :  { %v94_v44 = vadd.f32 %v93_v43, %v88_v42  ;;  %v132_v55 = vadd.f32 %v131_v49, %v126_v51 }
  0x95   :  { %v95_v46 = vmax.f32 %v94_v44, 0.0  ;;  %v110_v47 = vpop.permute.xlu1 %109  ;;  %v141_v50 = vpop.permute.xlu0 %140 }
  0x96   :  { %v143_v57 = vmul.f32 %v141_v50, %v67_v38  ;;  %v112_v58 = vmul.f32 %v110_v47, %v57_v31 }
  0x97   :  { %147 = vrot.lane.b32.xlu1 %v95_v46, %s222_s1 }
  0x98   :  { %v113_v63 = vadd.f32 %v112_v58, %v107_v60 }
  0x9a   :  { %v135_v54 = vpop.permute.xlu1 %134  ;;  %v52_v7 = vpop.permute.xlu0 %51 }
  0x9b   :  { %v137_v56 = vmul.f32 %v135_v54, %v57_v31  ;;  %v58_v10 = vmul.f32 %v57_v31, %v52_v7 }
  0x9d   :  { %v138_v59 = vadd.f32 %v137_v56, %v132_v55 }
  0x9f   :  { %v144_v61 = vadd.f32 %v143_v57, %v138_v59  ;;  %v116_v62 = vpop.permute.xlu1 %115 }
  0xa0   :  { %v118_v0 = vmul.f32 %v116_v62, %v67_v38 }
  0xa1   :  { %v145_v1 = vmax.f32 %v144_v61, 0.0 }
  0xa2   :  { %v119_v2 = vadd.f32 %v118_v0, %v113_v63 }
  0xa3   :  { %155 = vrot.lane.b32.xlu1 %v145_v1, %s223_s2 }
  0xa4   :  { %v120_v3 = vmax.f32 %v119_v2, 0.0  ;;  %v32_v4 = vpop.permute.xlu1 %31 }
  0xa5   :  { %v38_v5 = vmul.f32 %v37_v23, %v32_v4 }
  0xa6   :  { %151 = vrot.lane.b32.xlu0 %v120_v3, %s224_s21 }
  0xa7   :  { %v39_v6 = vadd.f32 %v169_v29, %v38_v5 }
  0xa9   :  { %v42_v8 = vpop.permute.xlu1 %41 }
  0xaa   :  { %v48_v9 = vmul.f32 %v47_v30, %v42_v8 }
  0xac   :  { %v49_v11 = vadd.f32 %v48_v9, %v39_v6 }
  0xae   :  { %v59_v12 = vadd.f32 %v58_v10, %v49_v11  ;;  %v62_v13 = vpop.permute.xlu1 %61 }
  0xaf   :  { %v68_v14 = vmul.f32 %v67_v38, %v62_v13 }
  0xb1   :  { %v69_v15 = vadd.f32 %v68_v14, %v59_v12 }
  0xb3   :  { %v70_v16 = vmax.f32 %v69_v15, 0.0 }
 0x109   :  { %v148_v17 = vpop.permute.xlu1 %147 }
 0x10a   :  { %v159_v18 = vsel %vm158_vm0, %v70_v16, %v148_v17 }
 0x115   :  { %v156_v20 = vpop.permute.xlu1 %155 }
 0x118   :  { %v152_v19 = vpop.permute.xlu0 %151 }
 0x119   :  { %v161_v21 = vsel %vm160_vm1, %v159_v18, %v152_v19 }
 0x11a   :  { %v163_v22 = vsel %vm162_vm2, %v161_v21, %v156_v20 }
 0x11b   :  { %164 = vst [vmem:[%s272_s5] sm:$0xff] %v163_v22 }

</bundles_post_ra>
